<compile_context>
chip_gen: v7x
topology: tpu7x:2x2x1
jax: 0.10.0
libtpu: 0.0.40
codegen_flags: <defaults>
</compile_context>

<pallas_src>
import functools
import math

import jax
import jax.numpy as jnp
from jax.experimental import pallas as pl
from jax.experimental.pallas import tpu as pltpu


def _round_up(x, m):
    return ((x + m - 1) // m) * m


def _fused_linear_kernel(fc7_ref, refine_ref, wt_ref, b_ref, o_ref, acc_ref,
                         *, mxu_dtype):
    k = pl.program_id(2)

    @pl.when(k == 0)
    def _init():
        acc_ref[...] = jnp.zeros_like(acc_ref)

    # Gate multiply in f32 on the VPU (safe on v5e as well).
    gated = fc7_ref[...] * refine_ref[...]                       # (tm, tk)
    # MXU matmul against the pre-transposed weight tile; f32 accumulation.
    acc_ref[...] += jnp.dot(gated.astype(mxu_dtype),
                            wt_ref[...].astype(mxu_dtype),
                            preferred_element_type=jnp.float32)  # (tm, tn)

    @pl.when(k == pl.num_programs(2) - 1)
    def _finalize():
        # Bias added exactly once per output tile, in the epilogue.
        o_ref[...] = (acc_ref[...] + b_ref[...]).astype(o_ref.dtype)


def recurrent_linear(input_fc7, recurrent_refine, weight, bias,
                     *, tm=128, tn=128, tk=128,
                     mxu_dtype=jnp.float32, vmem_limit_bytes=None):
    """y = (input_fc7 * recurrent_refine) @ weight.T + bias

    Fused, tiled Pallas TPU kernel.  Operands are zero-padded to lane-dense
    multiples of the tile shape; the result is sliced back to (N, out_features).
    """
    n, in_f = input_fc7.shape
    out_f = weight.shape[0]
    out_dtype = input_fc7.dtype

    # Pre-transpose weight once in HBM: (out_f, in_f) -> (in_f, out_f).
    wt = weight.T

    # Clamp tile sizes to the (padded) problem, respecting f32 (8, 128) tiling.
    tm = min(tm, _round_up(n, 8))
    tk = min(tk, _round_up(in_f, 128))
    tn = min(tn, _round_up(out_f, 128))

    mp = _round_up(n, tm)
    kp = _round_up(in_f, tk)
    np_ = _round_up(out_f, tn)

    # Zero-padding: padded K columns contribute 0 to the dot; padded M rows /
    # N columns are sliced off below.
    fc7_p = jnp.pad(input_fc7, ((0, mp - n), (0, kp - in_f)))
    ref_p = jnp.pad(recurrent_refine, ((0, mp - n), (0, kp - in_f)))
    wt_p = jnp.pad(wt, ((0, kp - in_f), (0, np_ - out_f)))
    bias_p = jnp.pad(bias, (0, np_ - out_f)).reshape(1, np_)

    grid = (mp // tm, np_ // tn, kp // tk)

    kernel = functools.partial(_fused_linear_kernel, mxu_dtype=mxu_dtype)

    out_p = pl.pallas_call(
        kernel,
        out_shape=jax.ShapeDtypeStruct((mp, np_), out_dtype),
        grid_spec=pltpu.PrefetchScalarGridSpec(
            num_scalar_prefetch=0,
            grid=grid,
            in_specs=[
                pl.BlockSpec((tm, tk), lambda i, j, k: (i, k)),   # fc7
                pl.BlockSpec((tm, tk), lambda i, j, k: (i, k)),   # refine
                pl.BlockSpec((tk, tn), lambda i, j, k: (k, j)),   # weight^T
                pl.BlockSpec((1, tn), lambda i, j, k: (0, j)),    # bias
            ],
            out_specs=pl.BlockSpec((tm, tn), lambda i, j, k: (i, j)),
            scratch_shapes=[pltpu.VMEM((tm, tn), jnp.float32)],
        ),
        compiler_params=pltpu.CompilerParams(
            dimension_semantics=("parallel", "parallel", "arbitrary"),
            vmem_limit_bytes=vmem_limit_bytes,  # raise only when using big tiles
        ),
    )(fc7_p, ref_p, wt_p, bias_p)

    return out_p[:n, :out_f]


def init_linear_params(key, in_features, out_features, dtype=jnp.float32):
    """Deterministic re-implementation of Linear.reset_parameters:
    weight, bias ~ U(-1/sqrt(in_features), 1/sqrt(in_features))."""
    stdv = 1.0 / math.sqrt(in_features)
    kw, kb = jax.random.split(key)
    weight = jax.random.uniform(kw, (out_features, in_features),
                                minval=-stdv, maxval=stdv, dtype=dtype)
    bias = jax.random.uniform(kb, (out_features,),
                              minval=-stdv, maxval=stdv, dtype=dtype)
    return weight, bias


def _reference(fc7, refine, weight, bias):
    return (fc7 * refine) @ weight.T + bias[None, :]


if __name__ == "__main__":
    key = jax.random.PRNGKey(0)
    k_fc7, k_ref, k_param, k2_fc7, k2_ref, k2_param = jax.random.split(key, 6)

    # --- Demo-sized problem consistent with the module: (N, in) -> (N, out) ---
    N, IN_F, OUT_F = 8, 32, 16
    input_fc7 = jax.random.normal(k_fc7, (N, IN_F), dtype=jnp.float32)
    recurrent_refine = jax.random.normal(k_ref, (N, IN_F), dtype=jnp.float32)
    weight, bias = init_linear_params(k_param, IN_F, OUT_F)

    out = recurrent_linear(input_fc7, recurrent_refine, weight, bias)
    out = jax.block_until_ready(out)
    ref = _reference(input_fc7, recurrent_refine, weight, bias)
    assert out.shape == (N, OUT_F)
    assert jnp.allclose(out, ref, atol=1e-5, rtol=1e-5)

    # --- Slightly larger case that exercises the full (M, N, K) grid with
    # multiple K reduction steps, accumulator init/finalize and padding. ---
    N2, IN2, OUT2 = 200, 384, 300  # non-multiples of the tile on purpose
    fc7_2 = jax.random.normal(k2_fc7, (N2, IN2), dtype=jnp.float32)
    ref_2 = jax.random.normal(k2_ref, (N2, IN2), dtype=jnp.float32)
    w2, b2 = init_linear_params(k2_param, IN2, OUT2)

    out2 = recurrent_linear(fc7_2, ref_2, w2, b2, tm=128, tn=128, tk=128)
    out2 = jax.block_until_ready(out2)
    ref2 = _reference(fc7_2, ref_2, w2, b2)
    assert out2.shape == (N2, OUT2)
    assert jnp.allclose(out2, ref2, atol=1e-4, rtol=1e-4)

    print("KERNEL_OK")
</pallas_src>

<mosaic_0001>
module attributes {stable_mosaic.version = 11 : i64} {
  func.func @_fused_linear_kernel(%arg0: i32, %arg1: i32, %arg2: i32, %arg3: memref<8x128xf32, #tpu.memory_space<vmem>>, %arg4: memref<8x128xf32, #tpu.memory_space<vmem>>, %arg5: memref<128x128xf32, #tpu.memory_space<vmem>>, %arg6: memref<1x128xf32, #tpu.memory_space<vmem>>, %arg7: memref<8x128xf32, #tpu.memory_space<vmem>>, %arg8: memref<8x128xf32, #tpu.memory_space<vmem>>) attributes {dimension_semantics = [#tpu.dimension_semantics<parallel>, #tpu.dimension_semantics<parallel>, #tpu.dimension_semantics<arbitrary>], iteration_bounds = array<i64: 1, 1, 1>, scalar_prefetch = 0 : i64, scratch_operands = 1 : i64, tpu.core_type = #tpu.core_type<tc>, window_params = [{transform_indices = @transform_0, window_bounds = array<i64: 8, 128>}, {transform_indices = @transform_1, window_bounds = array<i64: 8, 128>}, {transform_indices = @transform_2, window_bounds = array<i64: 128, 128>}, {transform_indices = @transform_3, window_bounds = array<i64: 1, 128>}, {transform_indices = @transform_4, window_bounds = array<i64: 8, 128>}]} {
    %c0_i32 = arith.constant 0 : i32
    %0 = arith.cmpi eq, %arg2, %c0_i32 : i32
    %1 = arith.extui %0 : i1 to i32
    %c0_i32_0 = arith.constant 0 : i32
    %2 = arith.cmpi ne, %1, %c0_i32_0 : i32
    scf.if %2 {
      %cst_12 = arith.constant 0.000000e+00 : f32
      %14 = vector.broadcast %cst_12 : f32 to vector<8x128xf32>
      %c0_13 = arith.constant 0 : index
      %c0_14 = arith.constant 0 : index
      %15 = vector.load %arg8[%c0_13, %c0_14] : memref<8x128xf32, #tpu.memory_space<vmem>>, vector<8x128xf32>
      tpu.vector_store %arg8[%c0_13, %c0_14], %14 {strides = array<i32>} : memref<8x128xf32, #tpu.memory_space<vmem>>, vector<8x128xf32>,
    } else {
    }
    %c0 = arith.constant 0 : index
    %c0_1 = arith.constant 0 : index
    %3 = vector.load %arg3[%c0, %c0_1] : memref<8x128xf32, #tpu.memory_space<vmem>>, vector<8x128xf32>
    %c0_2 = arith.constant 0 : index
    %c0_3 = arith.constant 0 : index
    %4 = vector.load %arg4[%c0_2, %c0_3] : memref<8x128xf32, #tpu.memory_space<vmem>>, vector<8x128xf32>
    %5 = arith.mulf %3, %4 : vector<8x128xf32>
    %c0_4 = arith.constant 0 : index
    %c0_5 = arith.constant 0 : index
    %6 = vector.load %arg8[%c0_4, %c0_5] : memref<8x128xf32, #tpu.memory_space<vmem>>, vector<8x128xf32>
    %c0_6 = arith.constant 0 : index
    %c0_7 = arith.constant 0 : index
    %7 = vector.load %arg5[%c0_6, %c0_7] : memref<128x128xf32, #tpu.memory_space<vmem>>, vector<128x128xf32>
    %cst = arith.constant dense<0.000000e+00> : vector<8x128xf32>
    %8 = tpu.matmul %5, %7, %cst {dimension_numbers = #tpu.dot_dimension_numbers<[1], [0], [0], [1], [0, 0, 1, 1], [], []>} : vector<8x128xf32>, vector<128x128xf32>, vector<8x128xf32> -> vector<8x128xf32>
    %9 = arith.addf %6, %8 : vector<8x128xf32>
    %c0_8 = arith.constant 0 : index
    %c0_9 = arith.constant 0 : index
    %10 = vector.load %arg8[%c0_8, %c0_9] : memref<8x128xf32, #tpu.memory_space<vmem>>, vector<8x128xf32>
    tpu.vector_store %arg8[%c0_8, %c0_9], %9 {strides = array<i32>} : memref<8x128xf32, #tpu.memory_space<vmem>>, vector<8x128xf32>,
    %c0_i32_10 = arith.constant 0 : i32
    %11 = arith.cmpi eq, %arg2, %c0_i32_10 : i32
    %12 = arith.extui %11 : i1 to i32
    %c0_i32_11 = arith.constant 0 : i32
    %13 = arith.cmpi ne, %12, %c0_i32_11 : i32
    scf.if %13 {
      %c0_12 = arith.constant 0 : index
      %c0_13 = arith.constant 0 : index
      %14 = vector.load %arg8[%c0_12, %c0_13] : memref<8x128xf32, #tpu.memory_space<vmem>>, vector<8x128xf32>
      %c0_14 = arith.constant 0 : index
      %c0_15 = arith.constant 0 : index
      %15 = vector.load %arg6[%c0_14, %c0_15] : memref<1x128xf32, #tpu.memory_space<vmem>>, vector<1x128xf32>
      %16 = vector.broadcast %15 : vector<1x128xf32> to vector<8x128xf32>
      %17 = arith.addf %14, %16 : vector<8x128xf32>
      %c0_16 = arith.constant 0 : index
      %c0_17 = arith.constant 0 : index
      %18 = vector.load %arg7[%c0_16, %c0_17] : memref<8x128xf32, #tpu.memory_space<vmem>>, vector<8x128xf32>
      tpu.vector_store %arg7[%c0_16, %c0_17], %17 {strides = array<i32>} : memref<8x128xf32, #tpu.memory_space<vmem>>, vector<8x128xf32>,
    } else {
    }
    return
  }
  func.func @transform_0(%arg0: i32, %arg1: i32, %arg2: i32) -> (i32, i32) {
    %c0_i32 = arith.constant 0 : i32
    return %arg0, %arg2 : i32, i32
  }
  func.func @transform_1(%arg0: i32, %arg1: i32, %arg2: i32) -> (i32, i32) {
    %c0_i32 = arith.constant 0 : i32
    return %arg0, %arg2 : i32, i32
  }
  func.func @transform_2(%arg0: i32, %arg1: i32, %arg2: i32) -> (i32, i32) {
    %c0_i32 = arith.constant 0 : i32
    return %arg2, %arg1 : i32, i32
  }
  func.func @transform_3(%arg0: i32, %arg1: i32, %arg2: i32) -> (i32, i32) {
    %c0_i32 = arith.constant 0 : i32
    %c0_i32_0 = arith.constant 0 : i32
    return %c0_i32, %arg1 : i32, i32
  }
  func.func @transform_4(%arg0: i32, %arg1: i32, %arg2: i32) -> (i32, i32) {
    %c0_i32 = arith.constant 0 : i32
    return %arg0, %arg1 : i32, i32
  }
}

</mosaic_0001>

<bundles_post_ra>
// kernel: tpu_custom_call.1
= control target key start
LH: loop header
LB: loop body
LE: loop exit
PB: predicated region body
PF: predicated region fallthrough
CT: control target
= control target key end

     0   :  { %9 = vsyncpa [#allocation4], 0  ;;  %s446_s0 = inlined_call_operand.hbm [shape: f32[8,128], index: 0, kind: input, shape index: {}]   ;;  %s447_s1 = inlined_call_operand.hbm [shape: f32[8,128], index: 1, kind: input, shape index: {}]   ;;  %s448_s2 = inlined_call_operand.hbm [shape: f32[128,128], index: 2, kind: input, shape index: {}]   ;;  %s449_s3 = inlined_call_operand.vmem [shape: f32[1,128], index: 3, kind: input, shape index: {}]   ;;  %s450_s4 = inlined_call_operand.hbm [shape: f32[8,128], index: 4, kind: output, shape index: {}]  }
   0x1   :  { %10 = vsyncpa [#allocation7], 0 }
   0x2   :  { %11 = vsyncpa [#allocation5], 0  ;;  %s361_s15 = smov [#allocation6]   ;;  %s362_s17 = smov [#allocation3]  }
   0x3   :  { %s28_s16 = sshll.u32 %s361_s15, 4  ;;  %s18_s18 = sshll.u32 %s362_s17, 4  ;;  %s29_s16 = int_to_ptr.vmem [resolvable:$true] %s28_s16  ;;  %s19_s18 = int_to_ptr.vmem [resolvable:$true] %s18_s18 }
   0x4   :  { %s267_s21 = scalar_lea.hbm %s447_s1, 128 }
   0x5   :  { %p268_p0 = scmp.ne.s32.totalorder %s447_s1, %s267_s21  ;;  %p271_p1 = scmp.lt.u32.totalorder %s267_s21, %s447_s1 }
   0x7   :  { %p273_p2 = pnand %p271_p1, %p268_p0 }
   0x9   :  { %276 = shalt.err (!%p273_p2)
}
   0xa   :  { %s277_s26 = scalar_lea.vmem %s29_s16, 128  ;;  %p282_p4 = scmp.lt.s32.totalorder %s29_s16, %s29_s16 }
   0xb   :  { %p278_p3 = scmp.ne.s32.totalorder %s29_s16, %s277_s26  ;;  %p283_p5 = scmp.lt.s32.totalorder %s277_s26, %s277_s26 }
   0xd   :  { %p284_p6 = por %p283_p5, %p282_p4 }
   0xf   :  { %p285_p7 = pnand %p284_p6, %p278_p3 }
  0x11   :  { %288 = shalt.err (!%p285_p7)
}
  0x12   :  { %31 = dma.hbm_to_vmem [thread:$0]  %s447_s1, 128, %s29_s16, [#allocation7]  }
  0x13   :  { %s289_s5 = scalar_lea.hbm %s446_s0, 128 }
  0x14   :  { %p290_p8 = scmp.ne.s32.totalorder %s446_s0, %s289_s5  ;;  %p293_p9 = scmp.lt.u32.totalorder %s289_s5, %s446_s0 }
  0x16   :  { %p295_p10 = pnand %p293_p9, %p290_p8 }
  0x18   :  { %298 = shalt.err (!%p295_p10)
}
  0x19   :  { %s299_s10 = scalar_lea.vmem %s19_s18, 128  ;;  %p304_p12 = scmp.lt.s32.totalorder %s19_s18, %s19_s18 }
  0x1a   :  { %p300_p11 = scmp.ne.s32.totalorder %s19_s18, %s299_s10  ;;  %p305_p13 = scmp.lt.s32.totalorder %s299_s10, %s299_s10 }
  0x1c   :  { %p306_p0 = por %p305_p13, %p304_p12 }
  0x1e   :  { %p307_p1 = pnand %p306_p0, %p300_p11 }
  0x20   :  { %310 = shalt.err (!%p307_p1)
}
  0x21   :  { %21 = dma.hbm_to_vmem [thread:$0]  %s446_s0, 128, %s19_s18, [#allocation4]  }
  0x22   :  { %s363_s12 = smov [#allocation8]   ;;  %s311_s16 = scalar_lea.hbm %s448_s2, 2048 }
  0x23   :  { %s37_s13 = sshll.u32 %s363_s12, 4  ;;  %p312_p2 = scmp.ne.s32.totalorder %s448_s2, %s311_s16  ;;  %s38_s13 = int_to_ptr.vmem [resolvable:$true] %s37_s13 }
  0x24   :  { %p315_p3 = scmp.lt.u32.totalorder %s311_s16, %s448_s2 }
  0x26   :  { %p317_p4 = pnand %p315_p3, %p312_p2 }
  0x28   :  { %320 = shalt.err (!%p317_p4)
}
  0x29   :  { %s321_s22 = scalar_lea.vmem %s38_s13, 2048  ;;  %p326_p6 = scmp.lt.s32.totalorder %s38_s13, %s38_s13 }
  0x2a   :  { %p322_p5 = scmp.ne.s32.totalorder %s38_s13, %s321_s22  ;;  %p327_p7 = scmp.lt.s32.totalorder %s321_s22, %s321_s22 }
  0x2c   :  { %p328_p8 = por %p327_p7, %p326_p6 }
  0x2e   :  { %p329_p9 = pnand %p328_p8, %p322_p5 }
  0x30   :  { %332 = shalt.err (!%p329_p9)
}
  0x31   :  { %s364_s0 = smov 128   ;;  %s365_s18 = smov 8  }
  0x32   :  { %43 = dma.hbm_to_vmem [thread:$0]  %s448_s2, 2048, %s38_s13, [#allocation7], %s364_s0, %s364_s0, %s365_s18  }
  0x33   :  { %355 = dma.done.wait [#allocation4], 128  }
  0x34   :  { %356 = vsyncadd [#allocation4], 4294967168 }
  0x35   :  { %357 = dma.done.wait [#allocation7], 2176  }
  0x36   :  { %358 = vsyncadd [#allocation7], 4294965120  ;;  %v366_v0 = vmov 0.0|0.0   ;;  %vm367_vm0 = vmmov 0   ;;  %v368_v1 = vmov 0.0   ;;  %v64_v2 = vld [vmem:[#allocation8] sm:$0xff] }
  0x37   :  { %234 = vmatprep.subr.bf16.mxu0 %v366_v0  ;;  %231 = vmatprep.mubr.msk.f32.mxu0 %vm367_vm0, %v368_v1  ;;  %v65_v3 = vld [vmem:[#allocation8 + $0x8] sm:$0xff]  ;;  %v66_v4 = vld [vmem:[#allocation8 + $0x10] sm:$0xff]  ;;  %v67_v6 = vld [vmem:[#allocation8 + $0x18] sm:$0xff]  ;;  %s369_s26 = smov [#allocation9]  }
  0x38   :  { %v235_v5 = vpack.c.bf16 %v65_v3, %v64_v2  ;;  %v238_v7 = vpack.c.bf16 %v67_v6, %v66_v4  ;;  %v68_v8 = vld [vmem:[#allocation8 + $0x20] sm:$0xff]  ;;  %v69_v9 = vld [vmem:[#allocation8 + $0x28] sm:$0xff]  ;;  %v70_v11 = vld [vmem:[#allocation8 + $0x30] sm:$0xff]  ;;  %s171_s27 = sshll.u32 %s369_s26, 4  ;;  %s172_s27 = int_to_ptr.vmem [resolvable:$true] %s171_s27 }
  0x39   :  { %v241_v10 = vpack.c.bf16 %v69_v9, %v68_v8  ;;  %v71_v12 = vld [vmem:[#allocation8 + $0x38] sm:$0xff]  ;;  %v72_v14 = vld [vmem:[#allocation8 + $0x40] sm:$0xff]  ;;  %v73_v15 = vld [vmem:[#allocation8 + $0x48] sm:$0xff]  ;;  %s333_s28 = scalar_lea.vmem %s172_s27, 128  ;;  %p338_p11 = scmp.lt.s32.totalorder %s172_s27, %s172_s27 }
  0x3a   :  { %236 = vmatpush3.bf16.msra.mxu0 %v235_v5  ;;  %v244_v13 = vpack.c.bf16 %v71_v12, %v70_v11  ;;  %v247_v16 = vpack.c.bf16 %v73_v15, %v72_v14  ;;  %v74_v17 = vld [vmem:[#allocation8 + $0x50] sm:$0xff]  ;;  %v75_v18 = vld [vmem:[#allocation8 + $0x58] sm:$0xff]  ;;  %v76_v20 = vld [vmem:[#allocation8 + $0x60] sm:$0xff]  ;;  %p334_p10 = scmp.ne.s32.totalorder %s172_s27, %s333_s28  ;;  %p339_p12 = scmp.lt.s32.totalorder %s333_s28, %s333_s28 }
  0x3b   :  { %237 = vmatprep.subr.bf16.mxu0 %v366_v0  ;;  %v250_v19 = vpack.c.bf16 %v75_v18, %v74_v17  ;;  %v77_v21 = vld [vmem:[#allocation8 + $0x68] sm:$0xff]  ;;  %v78_v23 = vld [vmem:[#allocation8 + $0x70] sm:$0xff]  ;;  %v79_v24 = vld [vmem:[#allocation8 + $0x78] sm:$0xff] }
  0x3c   :  { %v253_v22 = vpack.c.bf16 %v77_v21, %v76_v20  ;;  %v256_v25 = vpack.c.bf16 %v79_v24, %v78_v23  ;;  %v60_v26 = vld [vmem:[#allocation3] sm:$0xff]  ;;  %v61_v27 = vld [vmem:[#allocation6] sm:$0xff]  ;;  %p340_p13 = por %p339_p12, %p338_p11 }
  0x3d   :  { %v62_v28 = vmul.f32 %v61_v27, %v60_v26  ;;  %v181_v29 = vld [vmem:[%s449_s3] ss:$0 sm:$0xff] }
  0x3e   :  { %239 = vmatpush3.bf16.msra.mxu0 %v238_v7  ;;  %p341_p0 = pnand %p340_p13, %p334_p10 }
  0x3f   :  { %240 = vmatprep.subr.bf16.mxu0 %v366_v0 }
  0x42   :  { %242 = vmatpush3.bf16.msra.mxu0 %v241_v10 }
  0x43   :  { %243 = vmatprep.subr.bf16.mxu0 %v366_v0 }
  0x46   :  { %245 = vmatpush3.bf16.msra.mxu0 %v244_v13 }
  0x47   :  { %246 = vmatprep.subr.bf16.mxu0 %v366_v0 }
  0x4a   :  { %248 = vmatpush3.bf16.msra.mxu0 %v247_v16 }
  0x4b   :  { %249 = vmatprep.subr.bf16.mxu0 %v366_v0 }
  0x4e   :  { %251 = vmatpush3.bf16.msra.mxu0 %v250_v19 }
  0x4f   :  { %252 = vmatprep.subr.bf16.mxu0 %v366_v0 }
  0x52   :  { %254 = vmatpush3.bf16.msra.mxu0 %v253_v22 }
  0x53   :  { %255 = vmatprep.subr.bf16.mxu0 %v366_v0 }
  0x56   :  { %257 = vmatpush3.bf16.msra.mxu0 %v256_v25 }
  0x59   :  { %232 = vmatmul.mubr.f32.vlgmr.msra.gmra.mrb[0].mxu0 %v62_v28 }
 0x12c   :  { %v146_v30 = vpop.f32.mrb[0].mxu0 }
 0x12d   :  { %v163_v31 = vadd.f32 %v181_v29, %v146_v30  ;;  %v233_v32 = vpop.f32.mrb[1].mxu0 }
 0x12f   :  { %164 = vst [vmem:[#allocation9] sm:$0xff] %v163_v31 }
 0x130   :  { %344 = shalt.err (!%p341_p0)
}
 0x131   :  { %s345_s5 = scalar_lea.hbm %s450_s4, 128 }
 0x132   :  { %p346_p1 = scmp.ne.s32.totalorder %s450_s4, %s345_s5  ;;  %p349_p2 = scmp.lt.u32.totalorder %s345_s5, %s450_s4 }
 0x134   :  { %p351_p3 = pnand %p349_p2, %p346_p1 }
 0x136   :  { %354 = shalt.err (!%p351_p3)
}
 0x137   :  { %174 = dma.vmem_to_hbm [thread:$0]  %s172_s27, 128, %s450_s4, [#allocation5]  }
 0x138   :  { %359 = dma.done.wait [#allocation5], 128  }
 0x139   :  { %360 = vsyncadd [#allocation5], 4294967168 }
 0x13a   :  { %178 = vsyncpa [#allocation4], 1 }
 0x13b   :  { %179 = vsyncpa [#allocation7], 1 }
 0x13c   :  { %180 = vsyncpa [#allocation5], 1 }

</bundles_post_ra>
